<compile_context>
chip_gen: v6e
topology: v6e:2x2x1
jax: 0.10.0
libtpu: 0.0.40
codegen_flags: <defaults>
</compile_context>

<pallas_src>
import math

import jax
import jax.numpy as jnp
from jax.experimental import pallas as pl
from jax.experimental.pallas import tpu as pltpu

_LANE = 128
_SUBLANE = 8
_TARGET_BLOCK_BYTES = 4 * 1024 * 1024    # ~4 MiB/block; 4 buffers (in+out, double-buffered)
_VMEM_LIMIT_BYTES = 32 * 1024 * 1024     # safe on v5e/v6e (128 MiB phys) and v7x (64 MiB phys)


def _copy_kernel(x_ref, o_ref):
    # Straight copy of the current (tr, cols) lane/sublane-dense block.
    o_ref[...] = x_ref[...]


def _pick_cols(total: int):
    """Largest lane width such that total/cols is a multiple of 8 (sublane-dense)."""
    for cols in (1024, 512, 256, _LANE):
        if total % (cols * _SUBLANE) == 0:
            return cols
    return None


def _pick_row_tile(rows: int, cols: int, itemsize: int) -> int:
    """Largest divisor of `rows` that is a multiple of 8 and fits the block-byte target."""
    max_rows = max(_SUBLANE, _TARGET_BLOCK_BYTES // (cols * itemsize))
    m = rows // _SUBLANE
    cap = min(m, max(1, max_rows // _SUBLANE))
    for d in range(cap, 0, -1):
        if m % d == 0:
            return d * _SUBLANE
    return _SUBLANE


@jax.jit
def flatten_pallas(x: jax.Array) -> jax.Array:
    """Equivalent of PyTorch Flatten().forward(x): x.view(N, -1)."""
    n = x.shape[0]
    feat = math.prod(x.shape[1:]) if x.ndim > 1 else 1
    total = n * feat
    itemsize = jnp.dtype(x.dtype).itemsize

    # The flatten itself is pure metadata: row-major collapse of trailing dims.
    flat = jnp.reshape(x, (n, feat))

    cols = _pick_cols(total)
    if cols is None:
        # No (8,128)-dense 2-D factorization of the contiguous buffer: a copy
        # kernel would be pure overhead / risk an oversized block, so return
        # the zero-cost metadata reshape directly.
        return flat

    rows = total // cols
    tr = _pick_row_tile(rows, cols, itemsize)
    grid = (rows // tr,)
    block_bytes = tr * cols * itemsize

    # Re-view the contiguous buffer as a lane/sublane-dense 2-D slab so the
    # kernel's loads/stores are fully packed regardless of how small N is.
    slab = jnp.reshape(flat, (rows, cols))

    out = pl.pallas_call(
        _copy_kernel,
        out_shape=jax.ShapeDtypeStruct((rows, cols), x.dtype),
        grid_spec=pltpu.PrefetchScalarGridSpec(
            num_scalar_prefetch=0,
            grid=grid,
            in_specs=[pl.BlockSpec((tr, cols), lambda i: (i, 0))],
            out_specs=pl.BlockSpec((tr, cols), lambda i: (i, 0)),
        ),
        # Output aliases the input slab: in-place identity copy, one HBM buffer.
        input_output_aliases={0: 0},
        compiler_params=pltpu.CompilerParams(
            dimension_semantics=("parallel",),
            vmem_limit_bytes=max(_VMEM_LIMIT_BYTES, 4 * block_bytes + (1 << 20)),
        ),
        cost_estimate=pl.CostEstimate(
            flops=0,
            transcendentals=0,
            bytes_accessed=2 * total * itemsize,
        ),
    )(slab)

    # Metadata reshape back to the (N, C*H*W) flatten result.
    return jnp.reshape(out, (n, feat))


if __name__ == "__main__":
    # Small NCHW input consistent with a conv4 backbone feature map.
    key = jax.random.PRNGKey(0)
    N, C, H, W = 2, 4, 16, 16
    x = jax.random.normal(key, (N, C, H, W), dtype=jnp.float32)

    y = flatten_pallas(x)
    y = jax.block_until_ready(y)

    # Verify against the reference semantics of x.view(N, -1).
    y_ref = jnp.reshape(x, (N, C * H * W))
    assert y.shape == (N, C * H * W), y.shape
    assert y.dtype == x.dtype
    assert bool(jnp.array_equal(y, y_ref)), "mismatch vs reference flatten"

    print("KERNEL_OK")
</pallas_src>

<mosaic_0001>
module attributes {stable_mosaic.version = 11 : i64} {
  func.func @_copy_kernel(%arg0: i32, %arg1: memref<8x256xf32, #tpu.memory_space<vmem>>, %arg2: memref<8x256xf32, #tpu.memory_space<vmem>>) attributes {dimension_semantics = [#tpu.dimension_semantics<parallel>], iteration_bounds = array<i64: 1>, scalar_prefetch = 0 : i64, scratch_operands = 0 : i64, tpu.core_type = #tpu.core_type<tc>, window_params = [{transform_indices = @transform_0, window_bounds = array<i64: 8, 256>}, {transform_indices = @transform_1, window_bounds = array<i64: 8, 256>}]} {
    %c0 = arith.constant 0 : index
    %c0_0 = arith.constant 0 : index
    %0 = vector.load %arg1[%c0, %c0_0] : memref<8x256xf32, #tpu.memory_space<vmem>>, vector<8x256xf32>
    %c0_1 = arith.constant 0 : index
    %c0_2 = arith.constant 0 : index
    %1 = vector.load %arg2[%c0_1, %c0_2] : memref<8x256xf32, #tpu.memory_space<vmem>>, vector<8x256xf32>
    tpu.vector_store %arg2[%c0_1, %c0_2], %0 {strides = array<i32>} : memref<8x256xf32, #tpu.memory_space<vmem>>, vector<8x256xf32>,
    return
  }
  func.func @transform_0(%arg0: i32) -> (i32, i32) {
    %c0_i32 = arith.constant 0 : i32
    %c0_i32_0 = arith.constant 0 : i32
    return %arg0, %c0_i32 : i32, i32
  }
  func.func @transform_1(%arg0: i32) -> (i32, i32) {
    %c0_i32 = arith.constant 0 : i32
    %c0_i32_0 = arith.constant 0 : i32
    return %arg0, %c0_i32 : i32, i32
  }
}

</mosaic_0001>

<bundles_post_ra>
// kernel: flatten_pallas.1
= control target key start
LH: loop header
LB: loop body
LE: loop exit
PB: predicated region body
PF: predicated region fallthrough
CT: control target
= control target key end

     0   :  { %s38_s0 = inlined_call_operand.vmem [shape: f32[8,256], index: 0, kind: input, shape index: {}, may-alias: {0,1}]   ;;  %s39_s1 = inlined_call_operand.vmem [shape: f32[8,256], index: 1, kind: output, shape index: {}, may-alias: {0,1}]  }
   0x1   :  { %v8_v0 = vld [vmem:[%s38_s0] sm:$0xff]  ;;  %v9_v1 = vld [vmem:[%s38_s0 + $0x8] sm:$0xff] }
   0x2   :  { %10 = vst [vmem:[%s39_s1] sm:$0xff] %v8_v0  ;;  %11 = vst [vmem:[%s39_s1 + $0x8] sm:$0xff] %v9_v1 }

</bundles_post_ra>
